<compile_context>
chip_gen: v6e
topology: v6e:2x2x1
jax: 0.10.0
libtpu: 0.0.40
codegen_flags: <defaults>
</compile_context>

<pallas_src>
import jax
import jax.numpy as jnp
from jax.experimental import pallas as pl
from jax.experimental.pallas import tpu as pltpu


def _pick_row_width(H, W):
    """Smallest padded row width Wp >= W+2 such that H*Wp is a multiple of 128
    (lane-dense stores); falls back to W+2 if none is found nearby."""
    base = W + 2
    for wp in range(base, base + 17):
        if (H * wp) % 128 == 0:
            return wp
    return base


def _pick_images_per_step(n):
    """Fold several images into one grid step to amortize per-step overhead, but keep
    at least 2 grid steps so both v7x TensorCores get work."""
    for b in (8, 4, 2):
        if n % b == 0 and n // b >= 2:
            return b
    return 1


def prepare_br_params(w1, b1, w2, b2):
    """Hoisted (call-once) weight/bias repack.
    (Cout, Cin, 3, 3) -> (Cout, 9*Cin), column index = (ky*3 + kx)*Cin + cin,
    matching the tap-major / channel-minor im2col row order built in the kernel."""
    C = w1.shape[0]
    w1m = jnp.transpose(w1, (0, 2, 3, 1)).reshape(C, 9 * C).astype(jnp.float32)
    w2m = jnp.transpose(w2, (0, 2, 3, 1)).reshape(C, 9 * C).astype(jnp.float32)
    b1m = b1.reshape(C, 1).astype(jnp.float32)
    b2m = b2.reshape(C, 1).astype(jnp.float32)
    return w1m, b1m, w2m, b2m


@jax.jit
def br_module_apply(x_nchw, w1m, b1m, w2m, b2m):
    """x_nchw: (N, C, H, W); params from prepare_br_params. Returns (N, C, H, W)."""
    N, C, H, W = x_nchw.shape
    Wp = _pick_row_width(H, W)        # padded row width (lane-dense)
    Hp = H + 2
    L = H * Wp                        # wide output slab length per image
    HEAD = Wp + 1                     # offset of pixel (0,0) in the padded slab
    PADIM = L + 2 * Wp + 2            # padded slab length (covers the (ky=2,kx=2) tap)
    B = _pick_images_per_step(N)
    tap_offsets = tuple(ky * Wp + kx for ky in range(3) for kx in range(3))

    # Fully halo-padded, width-extended input slab (zeros pre-placed by the wrapper):
    #   (N, C, H, W) -> pad to (N, C, Hp, Wp) -> flatten -> pad lanes to PADIM.
    xp = jnp.pad(x_nchw, ((0, 0), (0, 0), (1, 1), (1, Wp - 1 - W)))
    xp = xp.reshape(N, C, Hp * Wp)
    xp = jnp.pad(xp, ((0, 0), (0, 0), (0, PADIM - Hp * Wp)))        # (N, C, PADIM)

    # Resident pad-column mask: lane p is a real pixel iff (p % Wp) < W.
    col = jnp.arange(L, dtype=jnp.int32) % Wp
    mask = jnp.broadcast_to((col < W).astype(jnp.float32), (C, L))

    def kernel(x_ref, mask_ref, w1_ref, b1_ref, w2_ref, b2_ref, o_ref, pad_ref):
        msk = mask_ref[...]                                          # (C, L), resident

        # Zero only the halo borders of the conv2 scratch; its interior (incl. the
        # per-row pad columns) is fully rewritten below with the masked ReLU output.
        pad_ref[:, 0:HEAD] = jnp.zeros((C, HEAD), jnp.float32)
        pad_ref[:, HEAD + L:PADIM] = jnp.zeros((C, PADIM - HEAD - L), jnp.float32)

        def conv3x3(taps, w_ref, b_ref):
            # Fused im2col: 9 shifted (C, L) views stacked to (9C, L), one MXU matmul
            # with K = 9C; bias folded into the epilogue.
            patches = jnp.concatenate(taps, axis=0)                  # (9C, L)
            return jnp.dot(w_ref[...], patches,
                           preferred_element_type=jnp.float32) + b_ref[...]

        for b in range(B):                 # static unroll; grid keeps >= 2 steps
            xb = x_ref[b].astype(jnp.float32)                        # (C, PADIM)
            taps1 = [xb[:, o:o + L] for o in tap_offsets]

            # conv1 + ReLU; mask the pad columns so they become the left/right halo
            # zeros when this slab is reused as conv2's padded input.
            y1 = jnp.maximum(conv3x3(taps1, w1_ref, b1_ref), 0.0) * msk
            pad_ref[:, HEAD:HEAD + L] = y1

            pad_full = pad_ref[...]
            taps2 = [pad_full[:, o:o + L] for o in tap_offsets]

            # conv2 + bias + residual (residual = center tap of the padded input slab).
            out = conv3x3(taps2, w2_ref, b2_ref) + taps1[4]
            o_ref[b] = out.astype(o_ref.dtype)

    out_wide = pl.pallas_call(
        kernel,
        out_shape=jax.ShapeDtypeStruct((N, C, L), x_nchw.dtype),
        grid_spec=pltpu.PrefetchScalarGridSpec(
            num_scalar_prefetch=0,
            grid=(N // B,),
            in_specs=[
                pl.BlockSpec((B, C, PADIM), lambda n: (n, 0, 0)),
                pl.BlockSpec((C, L), lambda n: (0, 0)),
                pl.BlockSpec((C, 9 * C), lambda n: (0, 0)),
                pl.BlockSpec((C, 1), lambda n: (0, 0)),
                pl.BlockSpec((C, 9 * C), lambda n: (0, 0)),
                pl.BlockSpec((C, 1), lambda n: (0, 0)),
            ],
            out_specs=pl.BlockSpec((B, C, L), lambda n: (n, 0, 0)),
            scratch_shapes=[pltpu.VMEM((C, PADIM), jnp.float32)],
        ),
        compiler_params=pltpu.CompilerParams(
            dimension_semantics=("parallel",)),
    )(xp, mask, w1m, b1m, w2m, b2m)

    # Drop the per-row pad columns and restore (N, C, H, W).  NOTE: callers must use
    # this wrapper — the raw kernel output's pad columns hold unnormalized garbage.
    return out_wide.reshape(N, C, H, Wp)[:, :, :, :W]


def br_module_forward(x, w1, b1, w2, b2):
    return br_module_apply(x, *prepare_br_params(w1, b1, w2, b2))


def br_module_reference(x, w1, b1, w2, b2):
    """Pure-JAX reference (NCHW) for verification."""
    dn = jax.lax.conv_dimension_numbers(x.shape, w1.shape, ('NCHW', 'OIHW', 'NCHW'))
    y = jax.lax.conv_general_dilated(x, w1, (1, 1), 'SAME', dimension_numbers=dn)
    y = y + b1[None, :, None, None]
    y = jnp.maximum(y, 0.0)
    y = jax.lax.conv_general_dilated(y, w2, (1, 1), 'SAME', dimension_numbers=dn)
    y = y + b2[None, :, None, None]
    return x + y


if __name__ == "__main__":
    N, C, H, W = 2, 4, 16, 16
    key = jax.random.PRNGKey(0)
    kx, kw1, kb1, kw2, kb2 = jax.random.split(key, 5)

    x = jax.random.normal(kx, (N, C, H, W), jnp.float32)
    # Synthetic parameters (shapes from nn.Conv2d(in_ch, in_ch, 3, padding=1)).
    w1 = jax.random.normal(kw1, (C, C, 3, 3), jnp.float32) * 0.1
    b1 = jax.random.normal(kb1, (C,), jnp.float32) * 0.1
    w2 = jax.random.normal(kw2, (C, C, 3, 3), jnp.float32) * 0.1
    b2 = jax.random.normal(kb2, (C,), jnp.float32) * 0.1

    # Weight repack hoisted out of the per-call path; apply is jitted.
    params = prepare_br_params(w1, b1, w2, b2)
    out = jax.block_until_ready(br_module_apply(x, *params))
    ref = jax.block_until_ready(br_module_reference(x, w1, b1, w2, b2))

    assert out.shape == (N, C, H, W)
    assert jnp.allclose(out, ref, atol=1e-4, rtol=1e-4), "mismatch vs JAX reference"
    print("KERNEL_OK")
</pallas_src>

<mosaic_0001>
module attributes {stable_mosaic.version = 11 : i64} {
  func.func @kernel(%arg0: i32, %arg1: memref<1x4x434xf32, #tpu.memory_space<vmem>>, %arg2: memref<4x384xf32, #tpu.memory_space<vmem>>, %arg3: memref<4x36xf32, #tpu.memory_space<vmem>>, %arg4: memref<4x1xf32, #tpu.memory_space<vmem>>, %arg5: memref<4x36xf32, #tpu.memory_space<vmem>>, %arg6: memref<4x1xf32, #tpu.memory_space<vmem>>, %arg7: memref<1x4x384xf32, #tpu.memory_space<vmem>>, %arg8: memref<4x434xf32, #tpu.memory_space<vmem>>) attributes {dimension_semantics = [#tpu.dimension_semantics<parallel>], iteration_bounds = array<i64: 2>, scalar_prefetch = 0 : i64, scratch_operands = 1 : i64, tpu.core_type = #tpu.core_type<tc>, window_params = [{transform_indices = @transform_0, window_bounds = array<i64: 1, 4, 434>}, {pipeline_mode = #tpu.pipeline_mode<synchronous>, transform_indices = @transform_1, window_bounds = array<i64: 4, 384>}, {pipeline_mode = #tpu.pipeline_mode<synchronous>, transform_indices = @transform_2, window_bounds = array<i64: 4, 36>}, {pipeline_mode = #tpu.pipeline_mode<synchronous>, transform_indices = @transform_3, window_bounds = array<i64: 4, 1>}, {pipeline_mode = #tpu.pipeline_mode<synchronous>, transform_indices = @transform_4, window_bounds = array<i64: 4, 36>}, {pipeline_mode = #tpu.pipeline_mode<synchronous>, transform_indices = @transform_5, window_bounds = array<i64: 4, 1>}, {transform_indices = @transform_6, window_bounds = array<i64: 1, 4, 384>}]} {
    %c0 = arith.constant 0 : index
    %c0_0 = arith.constant 0 : index
    %0 = vector.load %arg2[%c0, %c0_0] : memref<4x384xf32, #tpu.memory_space<vmem>>, vector<4x384xf32>
    %cst = arith.constant 0.000000e+00 : f32
    %1 = vector.broadcast %cst : f32 to vector<4x25xf32>
    %c0_1 = arith.constant 0 : index
    %c0_2 = arith.constant 0 : index
    %2 = vector.load %arg8[%c0_1, %c0_2] : memref<4x434xf32, #tpu.memory_space<vmem>>, vector<4x25xf32>
    tpu.vector_store %arg8[%c0_1, %c0_2], %1 {strides = array<i32>} : memref<4x434xf32, #tpu.memory_space<vmem>>, vector<4x25xf32>,
    %cst_3 = arith.constant 0.000000e+00 : f32
    %3 = vector.broadcast %cst_3 : f32 to vector<4x25xf32>
    %c0_4 = arith.constant 0 : index
    %c409 = arith.constant 409 : index
    %4 = vector.load %arg8[%c0_4, %c409] : memref<4x434xf32, #tpu.memory_space<vmem>>, vector<4x25xf32>
    tpu.vector_store %arg8[%c0_4, %c409], %3 {strides = array<i32>} : memref<4x434xf32, #tpu.memory_space<vmem>>, vector<4x25xf32>,
    %c0_5 = arith.constant 0 : index
    %c0_6 = arith.constant 0 : index
    %c0_7 = arith.constant 0 : index
    %5 = vector.load %arg1[%c0_5, %c0_6, %c0_7] : memref<1x4x434xf32, #tpu.memory_space<vmem>>, vector<1x4x434xf32>
    %6 = vector.shape_cast %5 : vector<1x4x434xf32> to vector<4x434xf32>
    %7 = vector.extract_strided_slice %6 {offsets = [0, 0], sizes = [4, 384], strides = [1, 1]} : vector<4x434xf32> to vector<4x384xf32>
    %8 = vector.extract_strided_slice %6 {offsets = [0, 1], sizes = [4, 384], strides = [1, 1]} : vector<4x434xf32> to vector<4x384xf32>
    %9 = vector.extract_strided_slice %6 {offsets = [0, 2], sizes = [4, 384], strides = [1, 1]} : vector<4x434xf32> to vector<4x384xf32>
    %10 = vector.extract_strided_slice %6 {offsets = [0, 24], sizes = [4, 384], strides = [1, 1]} : vector<4x434xf32> to vector<4x384xf32>
    %11 = vector.extract_strided_slice %6 {offsets = [0, 25], sizes = [4, 384], strides = [1, 1]} : vector<4x434xf32> to vector<4x384xf32>
    %12 = vector.extract_strided_slice %6 {offsets = [0, 26], sizes = [4, 384], strides = [1, 1]} : vector<4x434xf32> to vector<4x384xf32>
    %13 = vector.extract_strided_slice %6 {offsets = [0, 48], sizes = [4, 384], strides = [1, 1]} : vector<4x434xf32> to vector<4x384xf32>
    %14 = vector.extract_strided_slice %6 {offsets = [0, 49], sizes = [4, 384], strides = [1, 1]} : vector<4x434xf32> to vector<4x384xf32>
    %15 = vector.extract_strided_slice %6 {offsets = [0, 50], sizes = [4, 384], strides = [1, 1]} : vector<4x434xf32> to vector<4x384xf32>
    %16 = tpu.concatenate %7, %8, %9, %10, %11, %12, %13, %14, %15 in 0 : vector<4x384xf32>, vector<4x384xf32>, vector<4x384xf32>, vector<4x384xf32>, vector<4x384xf32>, vector<4x384xf32>, vector<4x384xf32>, vector<4x384xf32>, vector<4x384xf32> -> vector<36x384xf32>
    %c0_8 = arith.constant 0 : index
    %c0_9 = arith.constant 0 : index
    %17 = vector.load %arg3[%c0_8, %c0_9] : memref<4x36xf32, #tpu.memory_space<vmem>>, vector<4x36xf32>
    %cst_10 = arith.constant dense<0.000000e+00> : vector<4x384xf32>
    %18 = tpu.matmul %17, %16, %cst_10 {dimension_numbers = #tpu.dot_dimension_numbers<[1], [0], [0], [1], [0, 0, 1, 1], [], []>} : vector<4x36xf32>, vector<36x384xf32>, vector<4x384xf32> -> vector<4x384xf32>
    %c0_11 = arith.constant 0 : index
    %c0_12 = arith.constant 0 : index
    %19 = vector.load %arg4[%c0_11, %c0_12] : memref<4x1xf32, #tpu.memory_space<vmem>>, vector<4x1xf32>
    %20 = vector.broadcast %19 : vector<4x1xf32> to vector<4x384xf32>
    %21 = arith.addf %18, %20 : vector<4x384xf32>
    %cst_13 = arith.constant 0.000000e+00 : f32
    %22 = vector.broadcast %cst_13 : f32 to vector<4x384xf32>
    %23 = arith.maximumf %21, %22 : vector<4x384xf32>
    %24 = arith.mulf %23, %0 : vector<4x384xf32>
    %c0_14 = arith.constant 0 : index
    %c25 = arith.constant 25 : index
    %25 = vector.load %arg8[%c0_14, %c25] : memref<4x434xf32, #tpu.memory_space<vmem>>, vector<4x384xf32>
    tpu.vector_store %arg8[%c0_14, %c25], %24 {strides = array<i32>} : memref<4x434xf32, #tpu.memory_space<vmem>>, vector<4x384xf32>,
    %c0_15 = arith.constant 0 : index
    %c0_16 = arith.constant 0 : index
    %26 = vector.load %arg8[%c0_15, %c0_16] : memref<4x434xf32, #tpu.memory_space<vmem>>, vector<4x434xf32>
    %27 = vector.extract_strided_slice %26 {offsets = [0, 0], sizes = [4, 384], strides = [1, 1]} : vector<4x434xf32> to vector<4x384xf32>
    %28 = vector.extract_strided_slice %26 {offsets = [0, 1], sizes = [4, 384], strides = [1, 1]} : vector<4x434xf32> to vector<4x384xf32>
    %29 = vector.extract_strided_slice %26 {offsets = [0, 2], sizes = [4, 384], strides = [1, 1]} : vector<4x434xf32> to vector<4x384xf32>
    %30 = vector.extract_strided_slice %26 {offsets = [0, 24], sizes = [4, 384], strides = [1, 1]} : vector<4x434xf32> to vector<4x384xf32>
    %31 = vector.extract_strided_slice %26 {offsets = [0, 25], sizes = [4, 384], strides = [1, 1]} : vector<4x434xf32> to vector<4x384xf32>
    %32 = vector.extract_strided_slice %26 {offsets = [0, 26], sizes = [4, 384], strides = [1, 1]} : vector<4x434xf32> to vector<4x384xf32>
    %33 = vector.extract_strided_slice %26 {offsets = [0, 48], sizes = [4, 384], strides = [1, 1]} : vector<4x434xf32> to vector<4x384xf32>
    %34 = vector.extract_strided_slice %26 {offsets = [0, 49], sizes = [4, 384], strides = [1, 1]} : vector<4x434xf32> to vector<4x384xf32>
    %35 = vector.extract_strided_slice %26 {offsets = [0, 50], sizes = [4, 384], strides = [1, 1]} : vector<4x434xf32> to vector<4x384xf32>
    %36 = tpu.concatenate %27, %28, %29, %30, %31, %32, %33, %34, %35 in 0 : vector<4x384xf32>, vector<4x384xf32>, vector<4x384xf32>, vector<4x384xf32>, vector<4x384xf32>, vector<4x384xf32>, vector<4x384xf32>, vector<4x384xf32>, vector<4x384xf32> -> vector<36x384xf32>
    %c0_17 = arith.constant 0 : index
    %c0_18 = arith.constant 0 : index
    %37 = vector.load %arg5[%c0_17, %c0_18] : memref<4x36xf32, #tpu.memory_space<vmem>>, vector<4x36xf32>
    %cst_19 = arith.constant dense<0.000000e+00> : vector<4x384xf32>
    %38 = tpu.matmul %37, %36, %cst_19 {dimension_numbers = #tpu.dot_dimension_numbers<[1], [0], [0], [1], [0, 0, 1, 1], [], []>} : vector<4x36xf32>, vector<36x384xf32>, vector<4x384xf32> -> vector<4x384xf32>
    %c0_20 = arith.constant 0 : index
    %c0_21 = arith.constant 0 : index
    %39 = vector.load %arg6[%c0_20, %c0_21] : memref<4x1xf32, #tpu.memory_space<vmem>>, vector<4x1xf32>
    %40 = vector.broadcast %39 : vector<4x1xf32> to vector<4x384xf32>
    %41 = arith.addf %38, %40 : vector<4x384xf32>
    %42 = arith.addf %41, %11 : vector<4x384xf32>
    %c0_22 = arith.constant 0 : index
    %c0_23 = arith.constant 0 : index
    %c0_24 = arith.constant 0 : index
    %43 = vector.load %arg7[%c0_22, %c0_23, %c0_24] : memref<1x4x384xf32, #tpu.memory_space<vmem>>, vector<1x4x384xf32>
    %44 = vector.shape_cast %43 : vector<1x4x384xf32> to vector<4x384xf32>
    %45 = vector.shape_cast %42 : vector<4x384xf32> to vector<1x4x384xf32>
    tpu.vector_store %arg7[%c0_22, %c0_23, %c0_24], %45 {strides = array<i32>} : memref<1x4x384xf32, #tpu.memory_space<vmem>>, vector<1x4x384xf32>,
    return
  }
  func.func @transform_0(%arg0: i32) -> (i32, i32, i32) {
    %c0_i32 = arith.constant 0 : i32
    %c0_i32_0 = arith.constant 0 : i32
    %c0_i32_1 = arith.constant 0 : i32
    return %arg0, %c0_i32, %c0_i32_0 : i32, i32, i32
  }
  func.func @transform_1(%arg0: i32) -> (i32, i32) {
    %c0_i32 = arith.constant 0 : i32
    %c0_i32_0 = arith.constant 0 : i32
    %c0_i32_1 = arith.constant 0 : i32
    return %c0_i32, %c0_i32_0 : i32, i32
  }
  func.func @transform_2(%arg0: i32) -> (i32, i32) {
    %c0_i32 = arith.constant 0 : i32
    %c0_i32_0 = arith.constant 0 : i32
    %c0_i32_1 = arith.constant 0 : i32
    return %c0_i32, %c0_i32_0 : i32, i32
  }
  func.func @transform_3(%arg0: i32) -> (i32, i32) {
    %c0_i32 = arith.constant 0 : i32
    %c0_i32_0 = arith.constant 0 : i32
    %c0_i32_1 = arith.constant 0 : i32
    return %c0_i32, %c0_i32_0 : i32, i32
  }
  func.func @transform_4(%arg0: i32) -> (i32, i32) {
    %c0_i32 = arith.constant 0 : i32
    %c0_i32_0 = arith.constant 0 : i32
    %c0_i32_1 = arith.constant 0 : i32
    return %c0_i32, %c0_i32_0 : i32, i32
  }
  func.func @transform_5(%arg0: i32) -> (i32, i32) {
    %c0_i32 = arith.constant 0 : i32
    %c0_i32_0 = arith.constant 0 : i32
    %c0_i32_1 = arith.constant 0 : i32
    return %c0_i32, %c0_i32_0 : i32, i32
  }
  func.func @transform_6(%arg0: i32) -> (i32, i32, i32) {
    %c0_i32 = arith.constant 0 : i32
    %c0_i32_0 = arith.constant 0 : i32
    %c0_i32_1 = arith.constant 0 : i32
    return %arg0, %c0_i32, %c0_i32_0 : i32, i32, i32
  }
}

</mosaic_0001>

<bundles_post_ra>
// kernel: br_module_apply.1
= control target key start
LH: loop header
LB: loop body
LE: loop exit
PB: predicated region body
PF: predicated region fallthrough
CT: control target
= control target key end

     0   :  { %s1083_s21 = smov 0   ;;  %s1382_s0 = inlined_call_operand.vmem [shape: f32[2,4,434], index: 0, kind: input, shape index: {}]   ;;  %s1383_s1 = inlined_call_operand.vmem [shape: f32[4,384], index: 1, kind: input, shape index: {}]   ;;  %s1384_s2 = inlined_call_operand.vmem [shape: f32[4,36], index: 2, kind: input, shape index: {}]   ;;  %s1385_s3 = inlined_call_operand.vmem [shape: f32[4,1], index: 3, kind: input, shape index: {}]   ;;  %s1386_s4 = inlined_call_operand.vmem [shape: f32[4,36], index: 4, kind: input, shape index: {}]   ;;  %s1387_s5 = inlined_call_operand.vmem [shape: f32[4,1], index: 5, kind: input, shape index: {}]   ;;  %s1388_s6 = inlined_call_operand.vmem [shape: f32[2,4,384], index: 6, kind: output, shape index: {}]  }
   0x1 LB: > { %s938_s22 = sadd.s32 4294967295, %s1034_s21   ;;  %p942_p0 = scmp.ge.s32.totalorder %s1034_s21, 1  ;;  %s1034_s21 = sphi %s1083_s21, %s16_s21  }
   0x2   : > { %p212_p1 = scmp.lt.s32.totalorder %s1034_s21, 3 }
   0x4   : > { %p213_p2 = pnand %p942_p0, %p212_p1 }
   0x5   : > { %p242_p3 = scmp.lt.s32.totalorder (!%p213_p2), %s938_s22, 1  ;;  %s1036_s27 = smov (!%p213_p2), 80  }
   0x6   : > { %216 = sbr.rel (%p213_p2) target bundleno = 892 (0x37c), region = 44  ;;  %s1037_s28 = smov (!%p213_p2), 78  }
   0x7   : > { %s1038_s29 = smov (!%p213_p2), 79   ;;  %s1039_s30 = smov (!%p213_p2), 103  }
   0x8   : > { %s1040_s7 = smov (!%p213_p2), 102   ;;  %s1042_s8 = smov (!%p213_p2), 126  }
   0x9   : > { %s1043_s9 = smov (!%p213_p2), 104   ;;  %s1044_s10 = smov (!%p213_p2), 127  }
   0xa   : > { %s1047_s17 = smov (!%p213_p2), 25  }
   0xb   : > { %s1390_s22 = smov (!%p242_p3, %s938_s22), 1  ;;  %v1041_v5 = vmov 0.0   ;;  %vm1045_vm0 = vmmov 0   ;;  %v1046_v7 = vmov 0   ;;  %v398_v8 = vld [vmem:[%s1385_s3] sm:$0xf] }
   0xc   : > { %s958_s23 = sshll.u32 %s1390_s22, 4  ;;  %971 = vmatprep.subr.mxu1 %v1041_v5  ;;  %478 = vmatprep.mubr.f32.mxu0 %v1041_v5  ;;  %vm380_vm1 = vcmask 637952   ;;  %vm384_vm2 = vcmask 1043456   ;;  %vm365_vm3 = vcmask 646144   ;;  %vm350_vm4 = vcmask 654336  }
   0xd   : > { %s246_s26 = scalar_lea.vmem %s1382_s0, %s958_s23  ;;  %981 = vmatprep.mubr.msk.f32.mxu1 %vm1045_vm0, %v1041_v5  ;;  %1018 = vset.pattern.permute.xlu0 %v1046_v7  ;;  %vm320_vm5 = vcmask 842752   ;;  %vm335_vm6 = vcmask 834560   ;;  %vm290_vm7 = vcmask 1031168   ;;  %vm305_vm8 = vcmask 850944  }
   0xe   : > { %v1097_v0 = vld [vmem:[%s246_s26 + $0x8] sm:$0xff]  ;;  %v1099_v1 = vld [vmem:[%s246_s26] sm:$0xff]  ;;  %vm274_vm9 = vcmask 1039360   ;;  %vm404_vm10 = vcmask 293888   ;;  %vm254_vm11 = vcmask 199680   ;;  %vm256_vm12 = vcmask 404680  }
   0xf   : > { %346 = vrot.lane.b32.xlu1 %v1097_v0, %s1036_s27  ;;  %376 = vrot.lane.b32.xlu0 %v1097_v0, %s1037_s28  ;;  %v1107_v2 = vcombine.high %v1099_v1, %v1099_v1  ;;  %v265_v3 = vcombine.low %v1097_v0, %v1097_v0  ;;  %v264_v4 = vcombine.low %v1099_v1, %v1099_v1  ;;  %vm580_vm13 = vcmask 1043656   ;;  %s997_s26 = smul.u32 12, %s1390_s22 }
  0x10   : > { %v281_v6 = vcombine.high %v1097_v0, %v1097_v0  ;;  %255 = vst.msk [vmem:[#allocation2] sm:$0xf] %vm254_vm11, %v1041_v5  ;;  %vm581_vm14 = vcmask 1047556   ;;  %vm574_vm15 = vcmask 203776   ;;  %vm584_vm11 = vcmask 203780  }
  0x11   : > { %257 = vst.msk [vmem:[#allocation2 + $0xc] sm:$0xf] %vm256_vm12, %v1041_v5  ;;  %vm585_vm12 = vmor %vm584_vm11, %vm384_vm2 }
  0x13   : > { %359 = vrot.lane.b32.xlu0 %v1099_v1, %s1038_s29  ;;  %344 = vrot.lane.b32.xlu1 %v1107_v2, %s1036_s27 }
  0x17   : > { %361 = vrot.lane.b32.xlu1 %v265_v3, %s1038_s29  ;;  %374 = vrot.lane.b32.xlu0 %v1107_v2, %s1037_s28 }
  0x1b   : > { %342 = vrot.lane.b32.xlu1 %v1099_v1, %s1036_s27  ;;  %372 = vrot.lane.b32.xlu0 %v1099_v1, %s1037_s28 }
  0x1f   : > { %314 = vrot.lane.b32.xlu1 %v1107_v2, %s1039_s30  ;;  %357 = vrot.lane.b32.xlu0 %v264_v4, %s1038_s29 }
  0x23   : > { %329 = vrot.lane.b32.xlu1 %v1099_v1, %s1040_s7  ;;  %316 = vrot.lane.b32.xlu0 %v1097_v0, %s1039_s30 }
  0x27   : > { %312 = vrot.lane.b32.xlu1 %v1099_v1, %s1039_s30  ;;  %331 = vrot.lane.b32.xlu0 %v265_v3, %s1040_s7 }
  0x2b   : > { %284 = vrot.lane.b32.xlu1 %v1107_v2, %s1042_s8  ;;  %327 = vrot.lane.b32.xlu0 %v264_v4, %s1040_s7 }
  0x2f   : > { %299 = vrot.lane.b32.xlu1 %v1099_v1, %s1043_s9  ;;  %286 = vrot.lane.b32.xlu0 %v1097_v0, %s1042_s8 }
  0x33   : > { %378 = vrot.lane.b32.xlu1 %v281_v6, %s1037_s28  ;;  %301 = vrot.lane.b32.xlu0 %v265_v3, %s1043_s9 }
  0x37   : > { %297 = vrot.lane.b32.xlu1 %v264_v4, %s1043_s9  ;;  %282 = vrot.lane.b32.xlu0 %v1099_v1, %s1042_s8 }
  0x3b   : > { %363 = vrot.lane.b32.xlu1 %v1097_v0, %s1038_s29  ;;  %348 = vrot.lane.b32.xlu0 %v281_v6, %s1036_s27 }
  0x3f   : > { %270 = vrot.lane.b32.xlu1 %v265_v3, %s1044_s10  ;;  %268 = vrot.lane.b32.xlu0 %v1099_v1, %s1044_s10  ;;  %v397_v3 = vld [vmem:[%s1384_s2] sm:$0xf] }
  0x43   : > { %318 = vrot.lane.b32.xlu1 %v281_v6, %s1039_s30  ;;  %266 = vrot.lane.b32.xlu0 %v264_v4, %s1044_s10 }
  0x47   : > { %288 = vrot.lane.b32.xlu1 %v281_v6, %s1042_s8  ;;  %333 = vrot.lane.b32.xlu0 %v1097_v0, %s1040_s7 }
  0x4b   : > { %272 = vrot.lane.b32.xlu1 %v1097_v0, %s1044_s10  ;;  %303 = vrot.lane.b32.xlu0 %v1097_v0, %s1043_s9 }
  0x4f   : > { %401 = vperm.xlu0 %1018, %v398_v8  }
  0x81   : > { %v1170_v9 = vpop.permute.xlu1 %346  ;;  %v377_v10 = vpop.permute.xlu0 %376 }
  0x85   : > { %v360_v11 = vpop.permute.xlu0 %359  ;;  %v345_v12 = vpop.permute.xlu1 %344 }
  0x86   : > { %v352_v19 = vsel %vm350_vm4, %v345_v12, %v1170_v9 }
  0x89   : > { %v362_v13 = vpop.permute.xlu1 %361  ;;  %v375_v14 = vpop.permute.xlu0 %374 }
  0x8a   : > { %v382_v15 = vsel %vm380_vm1, %v375_v14, %v377_v10  ;;  %v367_v16 = vsel %vm365_vm3, %v360_v11, %v362_v13 }
  0x8b   : > { %946 = vmatprep.subr.msk.mxu0 %vm384_vm2, %v382_v15  ;;  %v395_v21 = vsel %vm384_vm2, %v352_v19, %v367_v16 }
  0x8d   : > { %v343_v17 = vpop.permute.xlu1 %342  ;;  %v373_v18 = vpop.permute.xlu0 %372 }
  0x8e   : > { %v381_v20 = vsel %vm380_vm1, %v373_v18, %v375_v14  ;;  %v351_v24 = vsel %vm350_vm4, %v343_v17, %v345_v12  ;;  %v252_v18 = vld [vmem:[%s1383_s1] sm:$0xff] }
  0x8f   : > { %947 = vmatpush1.msk.msra.mxu0 %vm384_vm2, %v381_v20 }
  0x90   : > { %438 = vmatprep.subr.mxu0 %v395_v21 }
  0x91   : > { %v315_v22 = vpop.permute.xlu1 %314  ;;  %v358_v23 = vpop.permute.xlu0 %357 }
  0x92   : > { %v366_v25 = vsel %vm365_vm3, %v358_v23, %v360_v11 }
  0x93   : > { %v394_v26 = vsel %vm384_vm2, %v351_v24, %v366_v25 }
  0x94   : > { %439 = vmatpush1.msra.mxu0 %v394_v26 }
  0x95   : > { %v330_v27 = vpop.permute.xlu1 %329  ;;  %v317_v28 = vpop.permute.xlu0 %316 }
  0x96   : > { %v1184_v31 = vsel %vm320_vm5, %v315_v22, %v317_v28 }
  0x99   : > { %v313_v29 = vpop.permute.xlu1 %312  ;;  %v332_v30 = vpop.permute.xlu0 %331 }
  0x9a   : > { %v337_v32 = vsel %vm335_vm6, %v330_v27, %v332_v30  ;;  %v1190_v36 = vsel %vm320_vm5, %v313_v29, %v315_v22  ;;  %v559_v22 = vcombine.high %v252_v18, %v252_v18  ;;  %v253_v29 = vld [vmem:[%s1383_s1 + $0x8] sm:$0xf] }
  0x9b   : > { %v392_v33 = vsel %vm384_vm2, %v1184_v31, %v337_v32 }
  0x9c   : > { %440 = vmatprep.subr.mxu0 %v392_v33 }
  0x9d   : > { %v285_v34 = vpop.permute.xlu1 %284  ;;  %v328_v35 = vpop.permute.xlu0 %327 }
  0x9e   : > { %v336_v37 = vsel %vm335_vm6, %v328_v35, %v330_v27 }
  0x9f   : > { %v391_v38 = vsel %vm384_vm2, %v1190_v36, %v336_v37 }
  0xa0   : > { %441 = vmatpush1.msra.mxu0 %v391_v38 }
  0xa1   : > { %v300_v39 = vpop.permute.xlu1 %299  ;;  %v287_v40 = vpop.permute.xlu0 %286 }
  0xa2   : > { %v292_v43 = vsel %vm290_vm7, %v285_v34, %v287_v40 }
  0xa5   : > { %v379_v41 = vpop.permute.xlu1 %378  ;;  %v302_v42 = vpop.permute.xlu0 %301 }
  0xa6   : > { %v307_v44 = vsel %vm305_vm8, %v300_v39, %v302_v42  ;;  %v383_v45 = vsel %vm380_vm1, %v377_v10, %v379_v41 }
  0xa7   : > { %972 = vmatpush3.msk.msra.mxu1 %vm384_vm2, %v383_v45  ;;  %v389_v46 = vsel %vm384_vm2, %v292_v43, %v307_v44 }
  0xa8   : > { %442 = vmatprep.subr.mxu0 %v389_v46  ;;  %973 = vmatprep.subr.mxu1 %v1041_v5 }
  0xa9   : > { %v298_v47 = vpop.permute.xlu1 %297  ;;  %v283_v48 = vpop.permute.xlu0 %282 }
  0xaa   : > { %v306_v49 = vsel %vm305_vm8, %v298_v47, %v300_v39  ;;  %v291_v50 = vsel %vm290_vm7, %v283_v48, %v285_v34  ;;  %v718_v48 = vld [vmem:[%s1387_s5] sm:$0xf] }
  0xab   : > { %v388_v51 = vsel %vm384_vm2, %v291_v50, %v306_v49 }
  0xac   : > { %443 = vmatpush1.msra.mxu0 %v388_v51 }
  0xad   : > { %v364_v52 = vpop.permute.xlu1 %363  ;;  %v349_v53 = vpop.permute.xlu0 %348 }
  0xae   : > { %v368_v54 = vsel %vm365_vm3, %v362_v13, %v364_v52  ;;  %v353_v55 = vsel %vm350_vm4, %v1170_v9, %v349_v53 }
  0xaf   : > { %v396_v56 = vsel %vm384_vm2, %v353_v55, %v368_v54 }
  0xb0   : > { %974 = vmatpush3.msra.mxu1 %v396_v56 }
  0xb1   : > { %v271_v57 = vpop.permute.xlu1 %270  ;;  %v269_v58 = vpop.permute.xlu0 %268  ;;  %975 = vmatprep.subr.mxu1 %v1041_v5 }
  0xb2   : > { %v276_v59 = vsel %vm274_vm9, %v269_v58, %v271_v57 }
  0xb3   : > { %v386_v60 = vsel %vm384_vm2, %v1107_v2, %v276_v59 }
  0xb4   : > { %444 = vmatprep.subr.mxu0 %v386_v60 }
  0xb5   : > { %v319_v61 = vpop.permute.xlu1 %318  ;;  %v267_v62 = vpop.permute.xlu0 %266 }
  0xb6   : > { %v275_v63 = vsel %vm274_vm9, %v267_v62, %v269_v58  ;;  %v1220_v2 = vsel %vm320_vm5, %v317_v28, %v319_v61 }
  0xb7   : > { %v385_v4 = vsel %vm384_vm2, %v1099_v1, %v275_v63 }
  0xb8   : > { %445 = vmatpush1.msra.mxu0 %v385_v4 }
  0xb9   : > { %v289_v6 = vpop.permute.xlu1 %288  ;;  %948 = vmatmul.mubr.msk.f32.vlgmr.msra.gmra.mxu0 %vm404_vm10, %v397_v3  ;;  %v334_v7 = vpop.permute.xlu0 %333 }
  0xba   : > { %v338_v8 = vsel %vm335_vm6, %v332_v30, %v334_v7  ;;  %797 = vmatprep.mubr.f32.mxu0 %v1041_v5  ;;  %v293_v1 = vsel %vm290_vm7, %v287_v40, %v289_v6 }
  0xbb   : > { %v393_v9 = vsel %vm384_vm2, %v1220_v2, %v338_v8 }
  0xbc   : > { %976 = vmatpush3.msra.mxu1 %v393_v9 }
  0xbd   : > { %v273_v10 = vpop.permute.xlu1 %272  ;;  %v304_v11 = vpop.permute.xlu0 %303  ;;  %977 = vmatprep.subr.mxu1 %v1041_v5 }
  0xbe   : > { %v277_v12 = vsel %vm274_vm9, %v271_v57, %v273_v10  ;;  %v308_v13 = vsel %vm305_vm8, %v302_v42, %v304_v11 }
  0xbf   : > { %v390_v14 = vsel %vm384_vm2, %v293_v1, %v308_v13  ;;  %v387_v15 = vsel %vm384_vm2, %v1097_v0, %v277_v12 }
  0xc0   : > { %978 = vmatpush3.msra.mxu1 %v390_v14 }
  0xc1   : > { %979 = vmatprep.subr.mxu1 %v1041_v5 }
  0xc2   : > { %980 = vmatpush3.msra.mxu1 %v387_v15 }
  0xc3   : > { %982 = vmatmul.mubr.msk.f32.vlgmr.msra.gmra.mxu1 %vm404_vm10, %v397_v3  ;;  %984 = vmatprep.subr.mxu1 %v1041_v5 }
  0xc4   : > { %994 = vmatprep.mubr.msk.f32.mxu1 %vm1045_vm0, %v1041_v5  ;;  %vm582_vm0 = vmor %vm581_vm14, %vm580_vm13 }
  0xca   : > { %v402_v16 = vpop.permute.xlu0 %401 }
 0x179   : > { %v480_v17 = vpop.f32.mrf.mxu0 }
 0x17a   : > { %v481_v19 = vadd.f32 %v480_v17, %v402_v16 }
 0x17b   : > { %v482_v0 = vpop.f32.mrf.mxu0 }
 0x17c   : > { %v555_v20 = vmax.f32 %v481_v19, 0.0  ;;  %v483_v21 = vadd.f32 %v482_v0, %v402_v16 }
 0x17e   : > { %v556_v23 = vmax.f32 %v483_v21, 0.0  ;;  %v561_v25 = vmul.f32 %v555_v20, %v252_v18 }
 0x180   : > { %v562_v24 = vmul.f32 %v559_v22, %v556_v23 }
 0x182   : > { %v567_v26 = vcombine.low %v561_v25, %v562_v24 }
 0x183   : > { %v551_v27 = vpop.f32.mrf.mxu1 }
 0x184   : > { %v552_v28 = vadd.f32 %v551_v27, %v402_v16  ;;  %568 = vrot.lane.b32.xlu1 %v567_v26, %s1047_s17 }
 0x185   : > { %v983_v30 = vpop.f32.mrf.mxu1 }
 0x186   : > { %v557_v32 = vmax.f32 %v552_v28, 0.0 }
 0x188   : > { %v563_v33 = vmul.f32 %v557_v32, %v253_v29 }
 0x18a   : > { %570 = vrot.lane.b32.xlu1 %v563_v33, %s1047_s17 }
 0x1f6   : > { %v569_v34 = vpop.permute.xlu1 %568 }
 0x1f7   : > { %v572_v35 = vrot.slane %v569_v34, 4 }
 0x1f9   : > { %v575_v37 = vsel %vm574_vm15, %v572_v35, %v569_v34 }
 0x1fa   : > { %583 = vst.msk [vmem:[#allocation2] sm:$0xff] %vm582_vm0, %v575_v37 }
 0x1fc   : > { %v571_v38 = vpop.permute.xlu1 %570 }
 0x1fd   : > { %v573_v39 = vrot.slane %v571_v38, 4 }
 0x1ff   : > { %v576_v40 = vsel %vm384_vm2, %v572_v35, %v573_v39 }
 0x200   : > { %v577_v41 = vsel %vm574_vm15, %v576_v40, %v571_v38 }
 0x201   : > { %586 = vst.msk [vmem:[#allocation2 + $0x8] sm:$0xff] %vm585_vm12, %v577_v41  ;;  %v1248_v42 = vld [vmem:[#allocation2] sm:$0xff] }
 0x202   : > { %666 = vrot.lane.b32.xlu1 %v1248_v42, %s1036_s27  ;;  %682 = vrot.lane.b32.xlu0 %v1248_v42, %s1038_s29  ;;  %v1282_v44 = vcombine.high %v1248_v42, %v1248_v42  ;;  %v593_v45 = vcombine.low %v1248_v42, %v1248_v42 }
 0x206   : > { %654 = vrot.lane.b32.xlu1 %v1248_v42, %s1040_s7  ;;  %694 = vrot.lane.b32.xlu0 %v1248_v42, %s1037_s28 }
 0x208   : > { %v1266_v43 = vld [vmem:[#allocation2 + $0x8] sm:$0xff] }
 0x209   : > { %v594_v46 = vcombine.low %v1266_v43, %v1266_v43  ;;  %v609_v47 = vcombine.high %v1266_v43, %v1266_v43 }
 0x20a   : > { %638 = vrot.lane.b32.xlu1 %v1248_v42, %s1039_s30  ;;  %610 = vrot.lane.b32.xlu0 %v1248_v42, %s1042_s8 }
 0x20e   : > { %626 = vrot.lane.b32.xlu1 %v1248_v42, %s1043_s9  ;;  %597 = vrot.lane.b32.xlu0 %v1248_v42, %s1044_s10 }
 0x212   : > { %642 = vrot.lane.b32.xlu0 %v1266_v43, %s1039_s30  ;;  %698 = vrot.lane.b32.xlu1 %v1266_v43, %s1037_s28 }
 0x216   : > { %614 = vrot.lane.b32.xlu0 %v1266_v43, %s1042_s8  ;;  %670 = vrot.lane.b32.xlu1 %v1266_v43, %s1036_s27 }
 0x21a   : > { %658 = vrot.lane.b32.xlu0 %v1266_v43, %s1040_s7  ;;  %686 = vrot.lane.b32.xlu1 %v1266_v43, %s1038_s29 }
 0x21e   : > { %696 = vrot.lane.b32.xlu0 %v1282_v44, %s1037_s28  ;;  %640 = vrot.lane.b32.xlu1 %v1282_v44, %s1039_s30 }
 0x222   : > { %668 = vrot.lane.b32.xlu0 %v1282_v44, %s1036_s27  ;;  %612 = vrot.lane.b32.xlu1 %v1282_v44, %s1042_s8 }
 0x226   : > { %680 = vrot.lane.b32.xlu0 %v593_v45, %s1038_s29  ;;  %624 = vrot.lane.b32.xlu1 %v593_v45, %s1043_s9 }
 0x22a   : > { %652 = vrot.lane.b32.xlu0 %v593_v45, %s1040_s7  ;;  %684 = vrot.lane.b32.xlu1 %v594_v46, %s1038_s29  ;;  %s251_s29 = scalar_lea.vmem %s1388_s6, %s997_s26 }
 0x22e   : > { %595 = vrot.lane.b32.xlu0 %v593_v45, %s1044_s10  ;;  %700 = vrot.lane.b32.xlu1 %v609_v47, %s1037_s28 }
 0x232   : > { %656 = vrot.lane.b32.xlu0 %v594_v46, %s1040_s7  ;;  %599 = vrot.lane.b32.xlu1 %v594_v46, %s1044_s10 }
 0x236   : > { %628 = vrot.lane.b32.xlu0 %v594_v46, %s1043_s9  ;;  %644 = vrot.lane.b32.xlu1 %v609_v47, %s1039_s30  ;;  %v717_v46 = vld [vmem:[%s1386_s4] sm:$0xf] }
 0x23a   : > { %672 = vrot.lane.b32.xlu0 %v609_v47, %s1036_s27  ;;  %616 = vrot.lane.b32.xlu1 %v609_v47, %s1042_s8 }
 0x23e   : > { %630 = vrot.lane.b32.xlu0 %v1266_v43, %s1043_s9  ;;  %601 = vrot.lane.b32.xlu1 %v1266_v43, %s1044_s10 }
 0x242   : > { %721 = vperm.xlu0 %1018, %v718_v48  }
 0x274   : > { %v683_v49 = vpop.permute.xlu0 %682  ;;  %v667_v50 = vpop.permute.xlu1 %666 }
 0x278   : > { %v695_v51 = vpop.permute.xlu0 %694  ;;  %v655_v52 = vpop.permute.xlu1 %654 }
 0x27c   : > { %v611_v53 = vpop.permute.xlu0 %610  ;;  %v639_v54 = vpop.permute.xlu1 %638 }
 0x280   : > { %v598_v55 = vpop.permute.xlu0 %597  ;;  %v627_v56 = vpop.permute.xlu1 %626 }
 0x284   : > { %v643_v57 = vpop.permute.xlu0 %642  ;;  %v699_v58 = vpop.permute.xlu1 %698 }
 0x288   : > { %v1317_v59 = vpop.permute.xlu0 %614  ;;  %v671_v60 = vpop.permute.xlu1 %670 }
 0x28c   : > { %v659_v61 = vpop.permute.xlu0 %658  ;;  %v687_v62 = vpop.permute.xlu1 %686 }
 0x290   : > { %v697_v63 = vpop.permute.xlu0 %696  ;;  %v641_v3 = vpop.permute.xlu1 %640 }
 0x291   : > { %v702_v4 = vsel %vm380_vm1, %v695_v51, %v697_v63  ;;  %v703_v6 = vsel %vm380_vm1, %v697_v63, %v699_v58  ;;  %v647_v23 = vsel %vm320_vm5, %v641_v3, %v643_v57  ;;  %v646_v25 = vsel %vm320_vm5, %v639_v54, %v641_v3 }
 0x292   : > { %951 = vmatprep.subr.msk.mxu0 %vm384_vm2, %v703_v6 }
 0x293   : > { %952 = vmatpush1.msk.msra.mxu0 %vm384_vm2, %v702_v4 }
 0x294   : > { %v669_v7 = vpop.permute.xlu0 %668  ;;  %v613_v8 = vpop.permute.xlu1 %612 }
 0x295   : > { %v675_v13 = vsel %vm350_vm4, %v669_v7, %v671_v60  ;;  %v674_v15 = vsel %vm350_vm4, %v667_v50, %v669_v7  ;;  %v619_v32 = vsel %vm290_vm7, %v613_v8, %v1317_v59  ;;  %v618_v35 = vsel %vm290_vm7, %v611_v53, %v613_v8 }
 0x298   : > { %v681_v9 = vpop.permute.xlu0 %680  ;;  %v625_v10 = vpop.permute.xlu1 %624 }
 0x299   : > { %v688_v11 = vsel %vm365_vm3, %v681_v9, %v683_v49  ;;  %v632_v28 = vsel %vm305_vm8, %v625_v10, %v627_v56 }
 0x29a   : > { %v714_v17 = vsel %vm384_vm2, %v674_v15, %v688_v11  ;;  %v708_v39 = vsel %vm384_vm2, %v618_v35, %v632_v28 }
 0x29c   : > { %v653_v1 = vpop.permute.xlu0 %652  ;;  %v685_v12 = vpop.permute.xlu1 %684 }
 0x29d   : > { %v689_v14 = vsel %vm365_vm3, %v683_v49, %v685_v12  ;;  %v660_v20 = vsel %vm335_vm6, %v653_v1, %v655_v52  ;;  %v690_v47 = vsel %vm365_vm3, %v685_v12, %v687_v62 }
 0x29e   : > { %v715_v16 = vsel %vm384_vm2, %v675_v13, %v689_v14  ;;  %v711_v27 = vsel %vm384_vm2, %v646_v25, %v660_v20 }
 0x29f   : > { %757 = vmatprep.subr.mxu0 %v715_v16 }
 0x2a0   : > { %v596_v18 = vpop.permute.xlu0 %595  ;;  %758 = vmatpush1.msra.mxu0 %v714_v17  ;;  %v701_v19 = vpop.permute.xlu1 %700 }
 0x2a1   : > { %v704_v0 = vsel %vm380_vm1, %v699_v58, %v701_v19  ;;  %v603_v37 = vsel %vm274_vm9, %v596_v18, %v598_v55 }
 0x2a2   : > { %985 = vmatpush3.msk.msra.mxu1 %vm384_vm2, %v704_v0  ;;  %v705_v50 = vsel %vm384_vm2, %v1248_v42, %v603_v37 }
 0x2a3   : > { %986 = vmatprep.subr.mxu1 %v1041_v5 }
 0x2a4   : > { %v657_v21 = vpop.permute.xlu0 %656  ;;  %v600_v22 = vpop.permute.xlu1 %599 }
 0x2a5   : > { %v661_v24 = vsel %vm335_vm6, %v655_v52, %v657_v21  ;;  %v604_v33 = vsel %vm274_vm9, %v598_v55, %v600_v22  ;;  %v662_v52 = vsel %vm335_vm6, %v657_v21, %v659_v61 }
 0x2a6   : > { %v712_v26 = vsel %vm384_vm2, %v647_v23, %v661_v24  ;;  %v706_v45 = vsel %vm384_vm2, %v1282_v44, %v604_v33 }
 0x2a7   : > { %759 = vmatprep.subr.mxu0 %v712_v26 }
 0x2a8   : > { %v629_v29 = vpop.permute.xlu0 %628  ;;  %760 = vmatpush1.msra.mxu0 %v711_v27  ;;  %v645_v30 = vpop.permute.xlu1 %644 }
 0x2a9   : > { %v633_v34 = vsel %vm305_vm8, %v627_v56, %v629_v29  ;;  %v648_v48 = vsel %vm320_vm5, %v643_v57, %v645_v30 }
 0x2aa   : > { %v709_v38 = vsel %vm384_vm2, %v619_v32, %v633_v34  ;;  %v713_v54 = vsel %vm384_vm2, %v648_v48, %v662_v52 }
 0x2ab   : > { %761 = vmatprep.subr.mxu0 %v709_v38 }
 0x2ac   : > { %v673_v40 = vpop.permute.xlu0 %672  ;;  %762 = vmatpush1.msra.mxu0 %v708_v39  ;;  %v617_v41 = vpop.permute.xlu1 %616 }
 0x2ad   : > { %v676_v49 = vsel %vm350_vm4, %v671_v60, %v673_v40  ;;  %763 = vmatprep.subr.mxu0 %v706_v45  ;;  %v620_v55 = vsel %vm290_vm7, %v1317_v59, %v617_v41 }
 0x2ae   : > { %764 = vmatpush1.msra.mxu0 %v705_v50  ;;  %v716_v51 = vsel %vm384_vm2, %v676_v49, %v690_v47 }
 0x2af   : > { %953 = vmatmul.mubr.msk.f32.vlgmr.msra.gmra.mxu0 %vm404_vm10, %v717_v46  ;;  %987 = vmatpush3.msra.mxu1 %v716_v51 }
 0x2b0   : > { %v631_v44 = vpop.permute.xlu0 %630  ;;  %988 = vmatprep.subr.mxu1 %v1041_v5  ;;  %v602_v53 = vpop.permute.xlu1 %601 }
 0x2b1   : > { %v634_v42 = vsel %vm305_vm8, %v629_v29, %v631_v44  ;;  %v605_v56 = vsel %vm274_vm9, %v600_v22, %v602_v53  ;;  %989 = vmatpush3.msra.mxu1 %v713_v54 }
 0x2b2   : > { %990 = vmatprep.subr.mxu1 %v1041_v5  ;;  %v710_v57 = vsel %vm384_vm2, %v620_v55, %v634_v42  ;;  %v707_v58 = vsel %vm384_vm2, %v1266_v43, %v605_v56 }
 0x2b3   : > { %991 = vmatpush3.msra.mxu1 %v710_v57 }
 0x2b4   : > { %992 = vmatprep.subr.mxu1 %v1041_v5 }
 0x2b5   : > { %993 = vmatpush3.msra.mxu1 %v707_v58 }
 0x2b6   : > { %995 = vmatmul.mubr.msk.f32.vlgmr.msra.gmra.mxu1 %vm404_vm10, %v717_v46 }
 0x2bd   : > { %v722_v60 = vpop.permute.xlu0 %721 }
 0x36f   : > { %v799_v59 = vpop.f32.mrf.mxu0 }
 0x370   : > { %v800_v61 = vadd.f32 %v799_v59, %v722_v60 }
 0x371   : > { %v801_v62 = vpop.f32.mrf.mxu0 }
 0x372   : > { %v802_v63 = vadd.f32 %v801_v62, %v722_v60  ;;  %v874_v3 = vadd.f32 %v800_v61, %v1190_v36 }
 0x374   : > { %v875_v4 = vadd.f32 %v802_v63, %v1184_v31 }
 0x376   : > { %v879_v5 = vcombine.low %v874_v3, %v875_v4  ;;  %v870_v6 = vpop.f32.mrf.mxu1 }
 0x377   : > { %v871_v43 = vadd.f32 %v870_v6, %v722_v60 }
 0x378   : > { %881 = vst [vmem:[%s251_s29] sm:$0xff] %v879_v5  ;;  %v996_v7 = vpop.f32.mrf.mxu1 }
 0x379   : > { %v876_v8 = vadd.f32 %v871_v43, %v1220_v2 }
 0x37b   : > { %882 = vst [vmem:[%s251_s29 + $0x8] sm:$0xf] %v876_v8 }
 0x37c PF: > { %s16_s21 = sadd.s32 1, %s1034_s21  }
 0x37d   : > { %p13_p4 = scmp.ge.s32.totalorder %s16_s21, 4  }
 0x37f   :  { %15 = sbr.rel (!%p13_p4) target bundleno = 1 (0x1), region = 74 }

</bundles_post_ra>
